<compile_context>
chip_gen: v6e
topology: v6e:2x2x1
jax: 0.10.0
libtpu: 0.0.40
codegen_flags: <defaults>
</compile_context>

<pallas_src>
import jax
import jax.numpy as jnp
from jax.experimental import pallas as pl
from jax.experimental.pallas import tpu as pltpu


def basic_nn_kernel(params_ref, x_ref, o_ref):
    # Scalar parameters live in SMEM (read scalarly, never re-DMA'd per tile).
    w00 = params_ref[0]
    b00 = params_ref[1]
    w01 = params_ref[2]
    w10 = params_ref[3]
    b10 = params_ref[4]
    w11 = params_ref[5]
    bf = params_ref[6]

    # Compute in f32 regardless of I/O dtype (v5e VPU has no bf16 math).
    x = x_ref[...].astype(jnp.float32)

    top = jnp.maximum(x * w00 + b00, 0.0) * w01   # relu(x*w00 + b00) * w01
    bot = jnp.maximum(x * w10 + b10, 0.0) * w11   # relu(x*w10 + b10) * w11
    o_ref[...] = jnp.maximum(top + bot + bf, 0.0).astype(o_ref.dtype)


# ~2 MiB per operand tile: measured mem-bound sweet spot (>=85% of HBM
# roofline); 2 operands x 2 pipeline buffers x 2 MiB = 8 MiB keeps us inside
# v5e's 16 MiB scoped-VMEM default (and well inside v6e/v7x budgets).
_TARGET_TILE_BYTES = 2 * 1024 * 1024

# Candidate contiguous lane widths (largest first): full-width slabs give one
# contiguous DMA per tile and guaranteed unmasked lane-dense stores.
_LANE_WIDTHS = (8192, 4096, 2048, 1024, 512, 256, 128)


def _sublane_multiple(dtype):
    # bf16 packs two rows per sublane -> min (16, 128) tile; f32 -> (8, 128).
    return 16 if jnp.dtype(dtype).itemsize == 2 else 8


def basic_nn_train_forward(x, params, *, lane_width=None, tile_rows=None):
    """Elementwise forward of BasicNN_train.

    x: any-shaped f32/bf16 array.
    params: f32[7] = (w00, b00, w01, w10, b10, w11, bf).
    """
    orig_shape = x.shape
    numel = x.size
    sub = _sublane_multiple(x.dtype)
    itemsize = jnp.dtype(x.dtype).itemsize

    # --- flattened (rows, lanes) layout: contiguous full-width tiles. -------
    tn = lane_width
    if tn is None:
        for cand in _LANE_WIDTHS:
            if numel % cand == 0:
                tn = cand
                break
    if tn is not None and numel % tn == 0:
        rows = numel // tn
        x2 = x.reshape(rows, tn)
    else:
        # Fallback for odd sizes: block equals the full array dims (allowed
        # even when not (8,128)-aligned).  Perf-only path.
        x2 = x.reshape(1, numel) if x.ndim <= 1 else x.reshape(-1, orig_shape[-1])
        rows, tn = x2.shape

    # --- rows per tile: ~2 MiB per operand tile, dtype-aware sublane multiple.
    bytes_per_row = max(1, tn * itemsize)
    tm = tile_rows if tile_rows is not None else max(
        sub, _TARGET_TILE_BYTES // bytes_per_row)
    tm = min(rows, tm)
    if tm < rows:
        tm = max(sub, (tm // sub) * sub)

    grid = (pl.cdiv(rows, tm),)

    out2 = pl.pallas_call(
        basic_nn_kernel,
        out_shape=jax.ShapeDtypeStruct((rows, tn), x.dtype),
        grid_spec=pltpu.PrefetchScalarGridSpec(
            num_scalar_prefetch=0,
            grid=grid,
            in_specs=[
                # Params: whole (7,) f32 array resident in SMEM.  (Not scalar
                # prefetch: f32 scalar-prefetch operands don't lower robustly
                # and the index_maps never needed them anyway.)
                pl.BlockSpec(memory_space=pltpu.MemorySpace.SMEM),
                pl.BlockSpec((tm, tn), lambda i: (i, 0)),
            ],
            out_specs=pl.BlockSpec((tm, tn), lambda i: (i, 0)),
        ),
        compiler_params=pltpu.CompilerParams(
            # Independent elementwise tiles.
            # TODO(synk): on v7x, CORE_PARALLEL / pl.core_map would engage both
            # TensorCores; kept "parallel" for portable lowering across chips.
            dimension_semantics=("parallel",),
        ),
    )(params, x2)

    return out2.reshape(orig_shape)


def reference_forward(x, params):
    x = x.astype(jnp.float32)
    w00, b00, w01, w10, b10, w11, bf = params
    top = jnp.maximum(x * w00 + b00, 0.0) * w01
    bot = jnp.maximum(x * w10 + b10, 0.0) * w11
    return jnp.maximum(top + bot + bf, 0.0)


if __name__ == "__main__":
    # Deterministic parameters, exactly as in the PyTorch __init__.
    params = jnp.array([1.7, -0.85, -40.8, 12.6, 0.0, 2.7, 0.0],
                       dtype=jnp.float32)

    key = jax.random.PRNGKey(0)
    k1, k2, k3 = jax.random.split(key, 3)

    # Case 1: 4-D "image batch" input; numel=2048 flattens to one (1, 2048) slab.
    x1 = jax.random.uniform(k1, (2, 4, 16, 16), dtype=jnp.float32)
    out1 = jax.block_until_ready(basic_nn_train_forward(x1, params))
    assert out1.shape == x1.shape and out1.dtype == x1.dtype
    assert jnp.allclose(out1, reference_forward(x1, params),
                        atol=1e-5, rtol=1e-5), "mismatch vs reference (4-D)"

    # Case 2: explicit multi-step 1-D grid: (64, 512) f32, (16, 512) tiles -> 4 steps.
    x2 = jax.random.uniform(k2, (64, 512), dtype=jnp.float32)
    out2 = jax.block_until_ready(
        basic_nn_train_forward(x2, params, lane_width=512, tile_rows=16))
    assert out2.shape == x2.shape and out2.dtype == x2.dtype
    assert jnp.allclose(out2, reference_forward(x2, params),
                        atol=1e-5, rtol=1e-5), "mismatch vs reference (gridded)"

    # Case 3: bf16 I/O (halved HBM bytes), f32 in-register compute, looser tol
    # because only the final result is rounded to bf16.
    x3 = jax.random.uniform(k3, (32, 256), dtype=jnp.float32).astype(jnp.bfloat16)
    out3 = jax.block_until_ready(
        basic_nn_train_forward(x3, params, lane_width=256, tile_rows=16))
    assert out3.shape == x3.shape and out3.dtype == jnp.bfloat16
    ref3 = reference_forward(x3, params)
    assert jnp.allclose(out3.astype(jnp.float32), ref3,
                        atol=0.5, rtol=2e-2), "mismatch vs reference (bf16)"

    print("KERNEL_OK")
</pallas_src>

<mosaic_0001>
module attributes {stable_mosaic.version = 11 : i64} {
  func.func @basic_nn_kernel(%arg0: i32, %arg1: memref<7xf32, #tpu.memory_space<smem>>, %arg2: memref<1x2048xf32, #tpu.memory_space<vmem>>, %arg3: memref<1x2048xf32, #tpu.memory_space<vmem>>) attributes {dimension_semantics = [#tpu.dimension_semantics<parallel>], iteration_bounds = array<i64: 1>, scalar_prefetch = 0 : i64, scratch_operands = 0 : i64, tpu.core_type = #tpu.core_type<tc>, window_params = [{transform_indices = @transform_0, window_bounds = array<i64: 7>}, {transform_indices = @transform_1, window_bounds = array<i64: 1, 2048>}, {transform_indices = @transform_2, window_bounds = array<i64: 1, 2048>}]} {
    %c0 = arith.constant 0 : index
    %0 = memref.load %arg1[%c0] : memref<7xf32, #tpu.memory_space<smem>>
    %c1 = arith.constant 1 : index
    %1 = memref.load %arg1[%c1] : memref<7xf32, #tpu.memory_space<smem>>
    %c2 = arith.constant 2 : index
    %2 = memref.load %arg1[%c2] : memref<7xf32, #tpu.memory_space<smem>>
    %c3 = arith.constant 3 : index
    %3 = memref.load %arg1[%c3] : memref<7xf32, #tpu.memory_space<smem>>
    %c4 = arith.constant 4 : index
    %4 = memref.load %arg1[%c4] : memref<7xf32, #tpu.memory_space<smem>>
    %c5 = arith.constant 5 : index
    %5 = memref.load %arg1[%c5] : memref<7xf32, #tpu.memory_space<smem>>
    %c6 = arith.constant 6 : index
    %6 = memref.load %arg1[%c6] : memref<7xf32, #tpu.memory_space<smem>>
    %c0_0 = arith.constant 0 : index
    %c0_1 = arith.constant 0 : index
    %7 = vector.load %arg2[%c0_0, %c0_1] : memref<1x2048xf32, #tpu.memory_space<vmem>>, vector<1x2048xf32>
    %8 = vector.broadcast %0 : f32 to vector<1x2048xf32>
    %9 = arith.mulf %7, %8 : vector<1x2048xf32>
    %10 = vector.broadcast %1 : f32 to vector<1x2048xf32>
    %11 = arith.addf %9, %10 : vector<1x2048xf32>
    %cst = arith.constant 0.000000e+00 : f32
    %12 = vector.broadcast %cst : f32 to vector<1x2048xf32>
    %13 = arith.maximumf %11, %12 : vector<1x2048xf32>
    %14 = vector.broadcast %2 : f32 to vector<1x2048xf32>
    %15 = arith.mulf %13, %14 : vector<1x2048xf32>
    %16 = vector.broadcast %3 : f32 to vector<1x2048xf32>
    %17 = arith.mulf %7, %16 : vector<1x2048xf32>
    %18 = vector.broadcast %4 : f32 to vector<1x2048xf32>
    %19 = arith.addf %17, %18 : vector<1x2048xf32>
    %cst_2 = arith.constant 0.000000e+00 : f32
    %20 = vector.broadcast %cst_2 : f32 to vector<1x2048xf32>
    %21 = arith.maximumf %19, %20 : vector<1x2048xf32>
    %22 = vector.broadcast %5 : f32 to vector<1x2048xf32>
    %23 = arith.mulf %21, %22 : vector<1x2048xf32>
    %24 = arith.addf %15, %23 : vector<1x2048xf32>
    %25 = vector.broadcast %6 : f32 to vector<1x2048xf32>
    %26 = arith.addf %24, %25 : vector<1x2048xf32>
    %cst_3 = arith.constant 0.000000e+00 : f32
    %27 = vector.broadcast %cst_3 : f32 to vector<1x2048xf32>
    %28 = arith.maximumf %26, %27 : vector<1x2048xf32>
    %c0_4 = arith.constant 0 : index
    %c0_5 = arith.constant 0 : index
    %29 = vector.load %arg3[%c0_4, %c0_5] : memref<1x2048xf32, #tpu.memory_space<vmem>>, vector<1x2048xf32>
    tpu.vector_store %arg3[%c0_4, %c0_5], %28 {strides = array<i32>} : memref<1x2048xf32, #tpu.memory_space<vmem>>, vector<1x2048xf32>,
    return
  }
  func.func @transform_0(%arg0: i32) -> i32 {
    %c0_i32 = arith.constant 0 : i32
    %c0_i32_0 = arith.constant 0 : i32
    return %c0_i32 : i32
  }
  func.func @transform_1(%arg0: i32) -> (i32, i32) {
    %c0_i32 = arith.constant 0 : i32
    %c0_i32_0 = arith.constant 0 : i32
    return %arg0, %c0_i32 : i32, i32
  }
  func.func @transform_2(%arg0: i32) -> (i32, i32) {
    %c0_i32 = arith.constant 0 : i32
    %c0_i32_0 = arith.constant 0 : i32
    return %arg0, %c0_i32 : i32, i32
  }
}

</mosaic_0001>

<bundles_post_ra>
// kernel: tpu_custom_call.1
= control target key start
LH: loop header
LB: loop body
LE: loop exit
PB: predicated region body
PF: predicated region fallthrough
CT: control target
= control target key end

     0   :  { %7 = vsyncpa [#allocation5], 0  ;;  %s181_s0 = inlined_call_operand.hbm [shape: f32[7], index: 0, kind: input, shape index: {}]   ;;  %s182_s1 = inlined_call_operand.hbm [shape: f32[1,2048], index: 1, kind: input, shape index: {}]   ;;  %s183_s2 = inlined_call_operand.hbm [shape: f32[1,2048], index: 2, kind: output, shape index: {}]  }
   0x1   :  { %8 = vsyncpa [#allocation3], 0 }
   0x2   :  { %9 = vsyncpa [#allocation4], 0  ;;  %s154_s9 = smov [#allocation2]   ;;  %s155_s12 = smov [#allocation6]  }
   0x3   :  { %17 = dma.hbm_to_smem %s181_s0, 16, %s154_s9, [#allocation5]  }
   0x4   :  { %s24_s13 = sshll.u32 %s155_s12, 4  ;;  %s25_s13 = int_to_ptr.vmem [resolvable:$true] %s24_s13 }
   0x5   :  { %s116_s14 = scalar_lea.vmem %s25_s13, 256  ;;  %p121_p1 = scmp.lt.s32.totalorder %s25_s13, %s25_s13 }
   0x6   :  { %p117_p0 = scmp.ne.s32.totalorder %s25_s13, %s116_s14  ;;  %p122_p2 = scmp.lt.s32.totalorder %s116_s14, %s116_s14 }
   0x8   :  { %p123_p3 = por %p122_p2, %p121_p1 }
   0xa   :  { %p124_p4 = pnand %p123_p3, %p117_p0 }
   0xc   :  { %127 = shalt.err (!%p124_p4)
}
   0xd   :  { %27 = dma.hbm_to_vmem [thread:$0]  %s182_s1, 256, %s25_s13, [#allocation3]  }
   0xe   :  { %148 = dma.done.wait [#allocation5], 16  }
   0xf   :  { %149 = vsyncadd [#allocation5], 4294967280 }
  0x10   :  { %150 = dma.done.wait [#allocation3], 256  }
  0x11   :  { %151 = vsyncadd [#allocation3], 4294967040 }
  0x12   :  { %34 = sfence }
  0x13   :  { %s35_s0 = sld [smem:[#allocation2]]  ;;  %v42_v0 = vld [vmem:[#allocation6] sm:$0xff]  ;;  %v43_v1 = vld [vmem:[#allocation6 + $0x8] sm:$0xff]  ;;  %s156_s1 = smov [#allocation7]  }
  0x14   :  { %s91_s17 = sld [smem:[#allocation2 + $0x1]]  ;;  %s81_s23 = sshll.u32 %s156_s1, 4  ;;  %s82_s23 = int_to_ptr.vmem [resolvable:$true] %s81_s23 }
  0x15   :  { %s92_s18 = sld [smem:[#allocation2 + $0x2]]  ;;  %s128_s24 = scalar_lea.vmem %s82_s23, 256 }
  0x16   :  { %s93_s19 = sld [smem:[#allocation2 + $0x3]]  ;;  %p129_p5 = scmp.ne.s32.totalorder %s82_s23, %s128_s24 }
  0x17   :  { %s94_s20 = sld [smem:[#allocation2 + $0x4]]  ;;  %p133_p6 = scmp.lt.s32.totalorder %s82_s23, %s82_s23 }
  0x18   :  { %s95_s21 = sld [smem:[#allocation2 + $0x5]]  ;;  %p134_p7 = scmp.lt.s32.totalorder %s128_s24, %s128_s24 }
  0x19   :  { %v44_v2 = vstv %s35_s0  ;;  %s96_s22 = sld [smem:[#allocation2 + $0x6]] }
  0x1a   :  { %v45_v3 = vmul.f32 %v44_v2, %v42_v0  ;;  %v47_v4 = vstv %s91_s17  ;;  %v46_v5 = vmul.f32 %v44_v2, %v43_v1  ;;  %p135_p8 = por %p134_p7, %p133_p6 }
  0x1b   :  { %v52_v13 = vstv %s92_s18 }
  0x1c   :  { %v48_v6 = vadd.f32 %v47_v4, %v45_v3  ;;  %v55_v7 = vstv %s93_s19  ;;  %v49_v8 = vadd.f32 %v47_v4, %v46_v5  ;;  %p136_p9 = pnand %p135_p8, %p129_p5 }
  0x1d   :  { %v56_v9 = vmul.f32 %v55_v7, %v42_v0  ;;  %v58_v10 = vstv %s94_s20  ;;  %v57_v11 = vmul.f32 %v55_v7, %v43_v1 }
  0x1e   :  { %v50_v12 = vmax.f32 %v48_v6, 0.0  ;;  %v51_v14 = vmax.f32 %v49_v8, 0.0  ;;  %v63_v17 = vstv %s95_s21 }
  0x1f   :  { %v59_v15 = vadd.f32 %v58_v10, %v56_v9  ;;  %v60_v16 = vadd.f32 %v58_v10, %v57_v11  ;;  %v68_v24 = vstv %s96_s22 }
  0x20   :  { %v53_v18 = vmul.f32 %v52_v13, %v50_v12  ;;  %v54_v20 = vmul.f32 %v52_v13, %v51_v14 }
  0x21   :  { %v61_v19 = vmax.f32 %v59_v15, 0.0  ;;  %v62_v21 = vmax.f32 %v60_v16, 0.0 }
  0x23   :  { %v64_v22 = vmul.f32 %v63_v17, %v61_v19  ;;  %v65_v23 = vmul.f32 %v63_v17, %v62_v21 }
  0x25   :  { %v66_v25 = vadd.f32 %v64_v22, %v53_v18  ;;  %v67_v26 = vadd.f32 %v65_v23, %v54_v20 }
  0x27   :  { %v69_v27 = vadd.f32 %v68_v24, %v66_v25  ;;  %v70_v28 = vadd.f32 %v68_v24, %v67_v26 }
  0x29   :  { %v71_v29 = vmax.f32 %v69_v27, 0.0  ;;  %v72_v30 = vmax.f32 %v70_v28, 0.0 }
  0x2b   :  { %73 = vst [vmem:[#allocation7] sm:$0xff] %v71_v29  ;;  %74 = vst [vmem:[#allocation7 + $0x8] sm:$0xff] %v72_v30 }
  0x2c   :  { %139 = shalt.err (!%p136_p9)
}
  0x2d   :  { %84 = dma.vmem_to_hbm [thread:$0]  %s82_s23, 256, %s183_s2, [#allocation4]  }
  0x2e   :  { %152 = dma.done.wait [#allocation4], 256  }
  0x2f   :  { %153 = vsyncadd [#allocation4], 4294967040 }
  0x30   :  { %88 = vsyncpa [#allocation3], 1 }
  0x31   :  { %89 = vsyncpa [#allocation4], 1 }
  0x32   :  { %90 = vsyncpa [#allocation5], 1 }

</bundles_post_ra>
